<compile_context>
chip_gen: v5e
topology: v5e:2x2
jax: 0.10.0
libtpu: 0.0.40
codegen_flags: <defaults>
</compile_context>

<pallas_src>
import functools

import jax
import jax.numpy as jnp
from jax.experimental import pallas as pl
from jax.experimental.pallas import tpu as pltpu


def _layernorm_kernel(x_ref, a_ref, b_ref, o_ref, *, eps, features):
    x = x_ref[...].astype(jnp.float32)            # (row_tile, F)
    a = a_ref[...]                                # (1, F) f32, resident
    b = b_ref[...]                                # (1, F) f32, resident

    mean = jnp.mean(x, axis=-1, keepdims=True)    # (row_tile, 1)
    centered = x - mean
    # torch.std() is the unbiased estimator (divide by N-1).
    denom = max(features - 1, 1)
    var = jnp.sum(centered * centered, axis=-1, keepdims=True) * (1.0 / denom)
    std = jnp.sqrt(var)
    # Reciprocal lowers to the EUP slot (otherwise idle); exact variant keeps
    # numerics equivalent to the divide.
    inv = pl.reciprocal(std + eps, approx=False)  # (row_tile, 1)
    o_ref[...] = (centered * inv * a + b).astype(o_ref.dtype)


def _choose_row_tile(rows, features, itemsize,
                     tile_budget_bytes=6 << 20, max_rows=1024):
    """Largest sublane-aligned (multiple-of-8) row tile within the VMEM budget."""
    bytes_per_row = max(features * itemsize, 1)
    fit = (tile_budget_bytes // bytes_per_row) // 8 * 8
    tile = int(max(8, min(fit, max_rows)))
    # Never ask for more rows than the (sublane-rounded) total.
    rows_rounded = ((rows + 7) // 8) * 8
    return int(max(8, min(tile, rows_rounded)))


def layer_norm(x, a_2, b_2, eps=1e-6, row_tile=None):
    """x: [..., features]; a_2, b_2: [features]."""
    features = x.shape[-1]
    orig_shape = x.shape
    rows = 1
    for d in orig_shape[:-1]:
        rows *= d
    x2 = x.reshape(rows, features)

    itemsize = jnp.dtype(x.dtype).itemsize
    if row_tile is None:
        row_tile = _choose_row_tile(rows, features, itemsize)

    # Params pre-cast once on the host side; they stay resident in VMEM.
    a2 = a_2.reshape(1, features).astype(jnp.float32)
    b2 = b_2.reshape(1, features).astype(jnp.float32)

    # No host-side padding: the final partial block is handled by Pallas
    # (padded reads, masked out-of-bounds writes).
    grid = (pl.cdiv(rows, row_tile),)

    # Double-buffered input + output tiles plus params and headroom, capped
    # below v7x's 64 MiB physical VMEM.
    tile_bytes = row_tile * features * itemsize
    vmem_limit = int(min(max(4 * tile_bytes + (8 << 20), 16 << 20), 48 << 20))

    kernel = functools.partial(_layernorm_kernel, eps=eps, features=features)

    out = pl.pallas_call(
        kernel,
        out_shape=jax.ShapeDtypeStruct((rows, features), x.dtype),
        grid_spec=pltpu.PrefetchScalarGridSpec(
            num_scalar_prefetch=0,
            grid=grid,
            in_specs=[
                pl.BlockSpec((row_tile, features), lambda i: (i, 0)),
                pl.BlockSpec((1, features), lambda i: (0, 0)),
                pl.BlockSpec((1, features), lambda i: (0, 0)),
            ],
            out_specs=pl.BlockSpec((row_tile, features), lambda i: (i, 0)),
        ),
        compiler_params=pltpu.CompilerParams(
            dimension_semantics=("parallel",),
            vmem_limit_bytes=vmem_limit,
        ),
    )(x2, a2, b2)

    return out.reshape(orig_shape)


def _reference(x, a_2, b_2, eps):
    features = x.shape[-1]
    mean = jnp.mean(x, axis=-1, keepdims=True)
    var = jnp.sum((x - mean) ** 2, axis=-1, keepdims=True) / (features - 1)
    return a_2 * (x - mean) / (jnp.sqrt(var) + eps) + b_2


if __name__ == "__main__":
    key = jax.random.PRNGKey(0)
    eps = 1e-6

    # Lane-dense feature width (multiple of 128) keeps stores unmasked.
    batch, seq, features = 2, 8, 128
    k1, k2 = jax.random.split(key)
    x = jax.random.normal(k1, (batch, seq, features), dtype=jnp.float32)
    a_2 = jnp.ones((features,), dtype=jnp.float32)
    b_2 = jnp.zeros((features,), dtype=jnp.float32)

    out = layer_norm(x, a_2, b_2, eps=eps)
    jax.block_until_ready(out)
    ref = _reference(x, a_2, b_2, eps)
    assert jnp.allclose(out, ref, atol=1e-4, rtol=1e-4), "mismatch vs reference"

    # Ragged row count (rows = 21, not a multiple of 8) exercises the
    # masked partial tail block -- no host-side padding involved.
    x2 = jax.random.normal(k2, (3, 7, features), dtype=jnp.float32)
    out2 = layer_norm(x2, a_2, b_2, eps=eps)
    jax.block_until_ready(out2)
    ref2 = _reference(x2, a_2, b_2, eps)
    assert jnp.allclose(out2, ref2, atol=1e-4, rtol=1e-4), "mismatch (ragged) vs reference"

    print("KERNEL_OK")
</pallas_src>

<mosaic_0001>
module attributes {stable_mosaic.version = 11 : i64} {
  func.func @_layernorm_kernel(%arg0: i32, %arg1: memref<16x128xf32, #tpu.memory_space<vmem>>, %arg2: memref<1x128xf32, #tpu.memory_space<vmem>>, %arg3: memref<1x128xf32, #tpu.memory_space<vmem>>, %arg4: memref<16x128xf32, #tpu.memory_space<vmem>>) attributes {dimension_semantics = [#tpu.dimension_semantics<parallel>], iteration_bounds = array<i64: 1>, scalar_prefetch = 0 : i64, scratch_operands = 0 : i64, tpu.core_type = #tpu.core_type<tc>, window_params = [{transform_indices = @transform_0, window_bounds = array<i64: 16, 128>}, {pipeline_mode = #tpu.pipeline_mode<synchronous>, transform_indices = @transform_1, window_bounds = array<i64: 1, 128>}, {pipeline_mode = #tpu.pipeline_mode<synchronous>, transform_indices = @transform_2, window_bounds = array<i64: 1, 128>}, {transform_indices = @transform_3, window_bounds = array<i64: 16, 128>}]} {
    %c0 = arith.constant 0 : index
    %c0_0 = arith.constant 0 : index
    %0 = vector.load %arg1[%c0, %c0_0] : memref<16x128xf32, #tpu.memory_space<vmem>>, vector<16x128xf32>
    %c0_1 = arith.constant 0 : index
    %c0_2 = arith.constant 0 : index
    %1 = vector.load %arg2[%c0_1, %c0_2] : memref<1x128xf32, #tpu.memory_space<vmem>>, vector<1x128xf32>
    %c0_3 = arith.constant 0 : index
    %c0_4 = arith.constant 0 : index
    %2 = vector.load %arg3[%c0_3, %c0_4] : memref<1x128xf32, #tpu.memory_space<vmem>>, vector<1x128xf32>
    %cst = arith.constant dense<0.000000e+00> : vector<16xf32>
    %3 = vector.multi_reduction <add>, %0, %cst [1] : vector<16x128xf32> to vector<16xf32>
    %4 = vector.shape_cast %3 : vector<16xf32> to vector<16x1xf32>
    %cst_5 = arith.constant 1.280000e+02 : f32
    %5 = vector.broadcast %cst_5 : f32 to vector<16x1xf32>
    %6 = arith.divf %4, %5 : vector<16x1xf32>
    %7 = vector.broadcast %6 : vector<16x1xf32> to vector<16x128xf32>
    %8 = arith.subf %0, %7 : vector<16x128xf32>
    %9 = arith.mulf %8, %8 : vector<16x128xf32>
    %cst_6 = arith.constant dense<0.000000e+00> : vector<16xf32>
    %10 = vector.multi_reduction <add>, %9, %cst_6 [1] : vector<16x128xf32> to vector<16xf32>
    %11 = vector.shape_cast %10 : vector<16xf32> to vector<16x1xf32>
    %cst_7 = arith.constant 0.00787401571 : f32
    %12 = vector.broadcast %cst_7 : f32 to vector<16x1xf32>
    %13 = arith.mulf %11, %12 : vector<16x1xf32>
    %14 = math.sqrt %13 : vector<16x1xf32>
    %cst_8 = arith.constant 9.99999997E-7 : f32
    %15 = vector.broadcast %cst_8 : f32 to vector<16x1xf32>
    %16 = arith.addf %14, %15 : vector<16x1xf32>
    %17 = tpu.reciprocal %16 : vector<16x1xf32> -> vector<16x1xf32>
    %18 = vector.broadcast %17 : vector<16x1xf32> to vector<16x128xf32>
    %19 = arith.mulf %8, %18 : vector<16x128xf32>
    %20 = vector.broadcast %1 : vector<1x128xf32> to vector<16x128xf32>
    %21 = arith.mulf %19, %20 : vector<16x128xf32>
    %22 = vector.broadcast %2 : vector<1x128xf32> to vector<16x128xf32>
    %23 = arith.addf %21, %22 : vector<16x128xf32>
    %c0_9 = arith.constant 0 : index
    %c0_10 = arith.constant 0 : index
    %24 = vector.load %arg4[%c0_9, %c0_10] : memref<16x128xf32, #tpu.memory_space<vmem>>, vector<16x128xf32>
    tpu.vector_store %arg4[%c0_9, %c0_10], %23 {strides = array<i32>} : memref<16x128xf32, #tpu.memory_space<vmem>>, vector<16x128xf32>,
    return
  }
  func.func @transform_0(%arg0: i32) -> (i32, i32) {
    %c0_i32 = arith.constant 0 : i32
    %c0_i32_0 = arith.constant 0 : i32
    return %arg0, %c0_i32 : i32, i32
  }
  func.func @transform_1(%arg0: i32) -> (i32, i32) {
    %c0_i32 = arith.constant 0 : i32
    %c0_i32_0 = arith.constant 0 : i32
    %c0_i32_1 = arith.constant 0 : i32
    return %c0_i32, %c0_i32_0 : i32, i32
  }
  func.func @transform_2(%arg0: i32) -> (i32, i32) {
    %c0_i32 = arith.constant 0 : i32
    %c0_i32_0 = arith.constant 0 : i32
    %c0_i32_1 = arith.constant 0 : i32
    return %c0_i32, %c0_i32_0 : i32, i32
  }
  func.func @transform_3(%arg0: i32) -> (i32, i32) {
    %c0_i32 = arith.constant 0 : i32
    %c0_i32_0 = arith.constant 0 : i32
    return %arg0, %c0_i32 : i32, i32
  }
}

</mosaic_0001>

<bundles_post_ra>
// kernel: tpu_custom_call.1
= control target key start
LH: loop header
LB: loop body
LE: loop exit
PB: predicated region body
PF: predicated region fallthrough
CT: control target
= control target key end

     0   :  { %8 = vsyncpa [#allocation3], 0  ;;  %s305_s0 = inlined_call_operand.hbm [shape: f32[16,128], index: 0, kind: input, shape index: {}]   ;;  %s306_s1 = inlined_call_operand.hbm [shape: f32[1,128], index: 1, kind: input, shape index: {}]   ;;  %s307_s2 = inlined_call_operand.vmem [shape: f32[1,128], index: 2, kind: input, shape index: {}]   ;;  %s308_s3 = inlined_call_operand.hbm [shape: f32[16,128], index: 3, kind: output, shape index: {}]  }
   0x1   :  { %9 = vsyncpa [#allocation6], 0 }
   0x2   :  { %10 = vsyncpa [#allocation4], 0  ;;  %s15_s14 = sshll.u32 %s305_s0, 4  ;;  %s256_s15 = smov [#allocation2]   ;;  %s16_s14 = int_to_ptr.hbm [resolvable:$true] %s15_s14 }
   0x3   :  { %s17_s16 = sshll.u32 %s256_s15, 4  ;;  %s29_s19 = sshll.u32 %s306_s1, 4  ;;  %s18_s16 = int_to_ptr.vmem [resolvable:$true] %s17_s16  ;;  %s30_s19 = int_to_ptr.hbm [resolvable:$true] %s29_s19 }
   0x4   :  { %s257_s20 = smov 128   ;;  %s258_s21 = smov 8  }
   0x5   :  { %23 = dma.hbm_to_vmem [thread:$0]  %s16_s14, 256, %s18_s16, [#allocation3], %s257_s20, %s257_s20, %s258_s21  }
   0x6   :  { %s259_s22 = smov [#allocation5]  }
   0x7   :  { %s31_s23 = sshll.u32 %s259_s22, 4  ;;  %s32_s23 = int_to_ptr.vmem [resolvable:$true] %s31_s23 }
   0x8   :  { %34 = dma.hbm_to_vmem [thread:$0]  %s30_s19, 16, %s32_s23, [#allocation6]  }
   0x9   :  { %250 = dma.done.wait [#allocation3], 256  }
   0xa   :  { %251 = vsyncadd [#allocation3], 4294967040 }
   0xb   :  { %252 = dma.done.wait [#allocation6], 16  }
   0xc   :  { %253 = vsyncadd [#allocation6], 4294967280  ;;  %v45_v0 = vld [vmem:[#allocation2] sm:$0xff]  ;;  %v46_v1 = vld [vmem:[#allocation2 + $0x8] sm:$0xff]  ;;  %v260_v2 = vmov 128.0   ;;  %s261_s24 = smov [#allocation7]  }
   0xd   :  { %49 = vadd.xlane.f32.xlu0 %v45_v0  ;;  %168 = vrcp.f32 %v260_v2  ;;  %v166_v54 = vld [vmem:[#allocation5] ss:$0 sm:$0xff]  ;;  %v167_v58 = vld [vmem:[%s307_s2] ss:$0 sm:$0xff]  ;;  %s144_s25 = sshll.u32 %s261_s24, 4  ;;  %s146_s27 = sshll.u32 %s308_s3, 4  ;;  %s145_s25 = int_to_ptr.vmem [resolvable:$true] %s144_s25  ;;  %s147_s27 = int_to_ptr.hbm [resolvable:$true] %s146_s27 }
  0x13   :  { %v169_v3 = vpop.eup %168 }
  0x14   :  { %v54_v4 = vmul.f32 128.0, %v169_v3  ;;  %vm58_vm0 = vweird.f32 %v169_v3 }
  0x15   :  { %51 = vadd.xlane.f32.xlu0 %v46_v1 }
  0x16   :  { %v55_v5 = vsub.f32 1.0, %v54_v4 }
  0x18   :  { %v56_v6 = vmul.f32 %v169_v3, %v55_v5 }
  0x1a   :  { %v57_v7 = vadd.f32 %v169_v3, %v56_v6 }
  0x1c   :  { %v59_v8 = vsel %vm58_vm0, %v169_v3, %v57_v7 }
  0x80   :  { %v50_v9 = vpop.xlane.xlu0 %49 }
  0x81   :  { %v60_v10 = vmul.f32 %v59_v8, %v50_v9 }
  0x83   :  { %v62_v11 = vsub.f32 %v45_v0, %v60_v10 }
  0x85   :  { %v64_v12 = vmul.f32 %v62_v11, %v62_v11 }
  0x87   :  { %66 = vadd.xlane.f32.xlu1 %v64_v12 }
  0x88   :  { %v52_v13 = vpop.xlane.xlu0 %51 }
  0x89   :  { %v61_v14 = vmul.f32 %v59_v8, %v52_v13 }
  0x8b   :  { %v291_v15 = vsub.f32 %v46_v1, %v61_v14 }
  0x8d   :  { %v65_v16 = vmul.f32 %v291_v15, %v291_v15 }
  0x8f   :  { %68 = vadd.xlane.f32.xlu1 %v65_v16 }
  0xfa   :  { %v67_v17 = vpop.xlane.xlu1 %66 }
  0xfb   :  { %v70_v18 = vmul.f32 0.007874016, %v67_v17 }
  0xfd   :  { %170 = vrsqrt.f32 %v70_v18  ;;  %vm79_vm1 = vcmp.eq.f32.partialorder %v70_v18, inf  ;;  %v82_v31 = vand.u32 2147483648, %v70_v18  ;;  %vm81_vm2 = vcmp.eq.f32.partialorder %v70_v18, 0.0 }
 0x102   :  { %v69_v19 = vpop.xlane.xlu1 %68 }
 0x103   :  { %v171_v20 = vpop.eup %170  ;;  %v71_v21 = vmul.f32 0.007874016, %v69_v19 }
 0x104   :  { %v73_v22 = vmul.f32 %v171_v20, %v70_v18 }
 0x105   :  { %172 = vrsqrt.f32 %v71_v21  ;;  %vm91_vm3 = vcmp.eq.f32.partialorder %v71_v21, inf  ;;  %v94_v39 = vand.u32 2147483648, %v71_v21  ;;  %vm93_vm4 = vcmp.eq.f32.partialorder %v71_v21, 0.0 }
 0x106   :  { %v74_v23 = vmul.f32 %v171_v20, %v73_v22 }
 0x108   :  { %v75_v24 = vmul.f32 0.5, %v74_v23 }
 0x10a   :  { %v76_v25 = vsub.f32 1.5, %v75_v24 }
 0x10b   :  { %v173_v26 = vpop.eup %172 }
 0x10c   :  { %v77_v27 = vmul.f32 %v171_v20, %v76_v25  ;;  %v85_v28 = vmul.f32 %v173_v26, %v71_v21 }
 0x10e   :  { %v78_v29 = vmul.f32 %v77_v27, %v70_v18  ;;  %v86_v30 = vmul.f32 %v173_v26, %v85_v28 }
 0x110   :  { %v80_v32 = vsel %vm79_vm1, %v70_v18, %v78_v29  ;;  %v87_v33 = vmul.f32 0.5, %v86_v30 }
 0x111   :  { %v83_v34 = vsel %vm81_vm2, %v82_v31, %v80_v32 }
 0x112   :  { %v96_v35 = vadd.f32 1e-06, %v83_v34  ;;  %v88_v36 = vsub.f32 1.5, %v87_v33 }
 0x114   :  { %174 = vrcp.f32 %v96_v35  ;;  %v89_v37 = vmul.f32 %v173_v26, %v88_v36  ;;  %v109_v46 = vand.u32 2147483648, %v96_v35  ;;  %v107_v48 = vand.u32 2147483647, %v96_v35 }
 0x115   :  { %vm103_vm6 = vweird.f32 %v96_v35 }
 0x116   :  { %v90_v38 = vmul.f32 %v89_v37, %v71_v21  ;;  %v110_v51 = vor.u32 1.1754944e-38, %v109_v46  ;;  %vm108_vm8 = vcmp.eq.f32.partialorder %v107_v48, 8.507059e+37 }
 0x118   :  { %v92_v40 = vsel %vm91_vm3, %v71_v21, %v90_v38 }
 0x119   :  { %v95_v41 = vsel %vm93_vm4, %v94_v39, %v92_v40 }
 0x11a   :  { %v175_v42 = vpop.eup %174  ;;  %v97_v43 = vadd.f32 1e-06, %v95_v41 }
 0x11b   :  { %v99_v44 = vmul.f32 %v175_v42, %v96_v35  ;;  %vm104_vm5 = vweird.f32 %v175_v42 }
 0x11c   :  { %176 = vrcp.f32 %v97_v43  ;;  %vm105_vm7 = vmor %vm103_vm6, %vm104_vm5  ;;  %v123_v59 = vand.u32 2147483648, %v97_v43  ;;  %v121_v61 = vand.u32 2147483647, %v97_v43  ;;  %vm117_vm10 = vweird.f32 %v97_v43 }
 0x11d   :  { %v100_v45 = vsub.f32 1.0, %v99_v44 }
 0x11e   :  { %v124_v1 = vor.u32 1.1754944e-38, %v123_v59  ;;  %vm122_vm12 = vcmp.eq.f32.partialorder %v121_v61, 8.507059e+37 }
 0x11f   :  { %v101_v47 = vmul.f32 %v175_v42, %v100_v45 }
 0x121   :  { %v102_v49 = vadd.f32 %v175_v42, %v101_v47 }
 0x122   :  { %v177_v50 = vpop.eup %176 }
 0x123   :  { %v106_v52 = vsel %vm105_vm7, %v175_v42, %v102_v49  ;;  %v113_v53 = vmul.f32 %v177_v50, %v97_v43  ;;  %vm118_vm9 = vweird.f32 %v177_v50 }
 0x124   :  { %v111_v55 = vsel %vm108_vm8, %v110_v51, %v106_v52  ;;  %vm119_vm11 = vmor %vm117_vm10, %vm118_vm9 }
 0x125   :  { %v114_v56 = vsub.f32 1.0, %v113_v53  ;;  %v126_v57 = vmul.f32 %v111_v55, %v62_v11 }
 0x127   :  { %v115_v60 = vmul.f32 %v177_v50, %v114_v56  ;;  %v131_v62 = vmul.f32 %v166_v54, %v126_v57 }
 0x129   :  { %v116_v63 = vadd.f32 %v177_v50, %v115_v60  ;;  %v136_v0 = vadd.f32 %v167_v58, %v131_v62 }
 0x12b   :  { %v120_v2 = vsel %vm119_vm11, %v177_v50, %v116_v63  ;;  %138 = vst [vmem:[#allocation7] sm:$0xff] %v136_v0 }
 0x12c   :  { %v125_v3 = vsel %vm122_vm12, %v124_v1, %v120_v2 }
 0x12d   :  { %v127_v4 = vmul.f32 %v125_v3, %v291_v15 }
 0x12f   :  { %v132_v5 = vmul.f32 %v166_v54, %v127_v4 }
 0x131   :  { %v137_v6 = vadd.f32 %v167_v58, %v132_v5 }
 0x133   :  { %139 = vst [vmem:[#allocation7 + $0x8] sm:$0xff] %v137_v6 }
 0x134   :  { %152 = dma.vmem_to_hbm [thread:$0]  %s145_s25, 256, %s147_s27, [#allocation4], %s257_s20, %s257_s20, %s258_s21  }
 0x135   :  { %254 = dma.done.wait [#allocation4], 256  }
 0x136   :  { %255 = vsyncadd [#allocation4], 4294967040 }
 0x137   :  { %157 = vsyncpa [#allocation3], 1 }
 0x138   :  { %158 = vsyncpa [#allocation6], 1 }
 0x139   :  { %159 = vsyncpa [#allocation4], 1 }

</bundles_post_ra>
